<compile_context>
chip_gen: v6e
topology: v6e:2x2x1
jax: 0.10.0
libtpu: 0.0.40
codegen_flags: <defaults>
</compile_context>

<pallas_src>
import math
import functools

import jax
import jax.numpy as jnp
from jax.experimental import pallas as pl
from jax.experimental.pallas import tpu as pltpu


MXU_DTYPE = jnp.bfloat16  # MXU operand dtype; accumulation is always f32.


def lambda_init_fn(dp):
    return 0.8 - 0.6 * math.exp(-0.3 * dp)


def _pick_tile(dim, cap):
    """Largest tile in {512, 256, 128} (<= cap) that divides `dim`, else full dim."""
    for t in (512, 256, 128):
        if t <= cap and dim % t == 0:
            return t
    return dim


# ----------------------------------------------------------------------------
# Tiled linear (no bias) kernel: y = x @ W.T   (x: (N, E), W: (F, E))
# ----------------------------------------------------------------------------
def _linear_kernel(x_ref, w_ref, o_ref, acc_ref):
    @pl.when(pl.program_id(2) == 0)
    def _init():
        acc_ref[...] = jnp.zeros_like(acc_ref)

    acc_ref[...] += jax.lax.dot_general(
        x_ref[...].astype(MXU_DTYPE),
        w_ref[...].astype(MXU_DTYPE),
        (((1,), (1,)), ((), ())),  # contract E: (tm,tk)·(tn,tk) -> (tm,tn)
        preferred_element_type=jnp.float32,
    )

    @pl.when(pl.program_id(2) == pl.num_programs(2) - 1)
    def _finalize():
        o_ref[...] = acc_ref[...].astype(o_ref.dtype)


def linear_nobias(x2d, w, *, tm_cap=256, tn_cap=256, tk_cap=512):
    """x2d: (N, E), w: (F, E) -> (N, F), matching nn.Linear(bias=False)."""
    n, e = x2d.shape
    f, e2 = w.shape
    assert e == e2
    tm = _pick_tile(n, tm_cap)
    tn = _pick_tile(f, tn_cap)
    tk = _pick_tile(e, tk_cap)
    grid = (n // tm, f // tn, e // tk)
    return pl.pallas_call(
        _linear_kernel,
        out_shape=jax.ShapeDtypeStruct((n, f), x2d.dtype),
        grid=grid,
        in_specs=[
            pl.BlockSpec((tm, tk), lambda i, j, k: (i, k)),
            pl.BlockSpec((tn, tk), lambda i, j, k: (j, k)),
        ],
        out_specs=pl.BlockSpec((tm, tn), lambda i, j, k: (i, j)),
        scratch_shapes=[pltpu.VMEM((tm, tn), jnp.float32)],
        compiler_params=pltpu.CompilerParams(
            dimension_semantics=("parallel", "parallel", "arbitrary")),
    )(x2d, w)


# ----------------------------------------------------------------------------
# Differential attention kernel (per batch, per head)
# ----------------------------------------------------------------------------
def _diff_attn_kernel(lam_ref, q_ref, k_ref, v_ref, a_ref, o_ref,
                      *, inv_scaling, one_minus_lambda_init, eps):
    # q_ref / k_ref : (1, 2, L, D2) -> the two sub-heads (2h, 2h+1) of this head
    # v_ref         : (1, 1, L, D)
    q = q_ref[0] * inv_scaling            # (2, L, D2) f32, pre-scaled
    k = k_ref[0]                          # (2, L, D2)
    v = v_ref[0, 0]                       # (L, D)
    seq_len = q.shape[1]

    # One batched matmul over the sub-head axis; bf16 operands, f32 accumulate.
    s = jax.lax.dot_general(
        q.astype(MXU_DTYPE), k.astype(MXU_DTYPE),
        (((2,), (2,)), ((0,), (0,))),     # contract D2, batch over sub-head axis
        preferred_element_type=jnp.float32,
    )                                     # (2, L, L)

    row = jax.lax.broadcasted_iota(jnp.int32, (seq_len, seq_len), 0)
    col = jax.lax.broadcasted_iota(jnp.int32, (seq_len, seq_len), 1)
    causal = (row >= col)[None, :, :]     # (1, L, L), broadcast to both sub-heads
    neg = jnp.finfo(jnp.float32).min      # torch.finfo(dtype).min
    s = jnp.where(causal, s, neg)

    # Softmax over keys (f32 statistics; reciprocal on EUP).
    m = jnp.max(s, axis=-1, keepdims=True)
    e = jnp.exp(s - m)
    denom = jnp.sum(e, axis=-1, keepdims=True)
    p = e * pl.reciprocal(denom, approx=True)   # (2, L, L)

    lam = lam_ref[0, 0]
    attn = p[0] - lam * p[1]              # differential attention weights
    a_ref[0, 0] = attn.astype(a_ref.dtype)

    o = jnp.dot(attn.astype(MXU_DTYPE), v.astype(MXU_DTYPE),
                preferred_element_type=jnp.float32)   # (L, D)

    # RMSNorm over head_dim, no affine (eps = 1e-5), then * (1 - lambda_init)
    ms = jnp.mean(o * o, axis=-1, keepdims=True) + eps
    o = o * jax.lax.rsqrt(ms) * one_minus_lambda_init
    o_ref[0, 0] = o.astype(o_ref.dtype)


# ----------------------------------------------------------------------------
# Full forward
# ----------------------------------------------------------------------------
def casual_multihead_diff_attn(x, params, n_head, layer_idx=0):
    b, l, e = x.shape
    head_dim = e // n_head
    d2 = head_dim // 2
    lambda_init = lambda_init_fn(layer_idx)
    inv_scaling = 1.0 / math.sqrt(head_dim // 2)

    # --- projections (tiled Pallas matmuls, x @ W.T) ---
    x2 = x.reshape(b * l, e)
    q = linear_nobias(x2, params["wq"]).reshape(b, l, e)
    k = linear_nobias(x2, params["wk"]).reshape(b, l, e)
    v = linear_nobias(x2, params["wv"]).reshape(b, l, e)

    # --- split heads (glue reshapes/transposes) ---
    qh = q.reshape(b, l, 2 * n_head, d2).transpose(0, 2, 1, 3)      # (B, 2H, L, D2)
    kh = k.reshape(b, l, 2 * n_head, d2).transpose(0, 2, 1, 3)      # (B, 2H, L, D2)
    vh = v.reshape(b, l, n_head, head_dim).transpose(0, 2, 1, 3)    # (B,  H, L, D)

    # lambda_full = exp(sum(lq1*lk1)) - exp(sum(lq2*lk2)) + lambda_init
    lam = (jnp.exp(jnp.sum(params["lq1"] * params["lk1"]))
           - jnp.exp(jnp.sum(params["lq2"] * params["lk2"]))
           + jnp.float32(lambda_init))
    lam = lam.reshape(1, 1).astype(jnp.float32)

    kernel = functools.partial(
        _diff_attn_kernel,
        inv_scaling=inv_scaling,
        one_minus_lambda_init=1.0 - lambda_init,
        eps=1e-5,
    )

    attn_w, o_heads = pl.pallas_call(
        kernel,
        out_shape=(
            jax.ShapeDtypeStruct((b, n_head, l, l), jnp.float32),
            jax.ShapeDtypeStruct((b, n_head, l, head_dim), jnp.float32),
        ),
        grid=(b, n_head),
        in_specs=[
            pl.BlockSpec(memory_space=pltpu.MemorySpace.SMEM),               # lambda scalar
            pl.BlockSpec((1, 2, l, d2), lambda bi, hi: (bi, hi, 0, 0)),      # Q sub-heads
            pl.BlockSpec((1, 2, l, d2), lambda bi, hi: (bi, hi, 0, 0)),      # K sub-heads
            pl.BlockSpec((1, 1, l, head_dim), lambda bi, hi: (bi, hi, 0, 0)),  # V
        ],
        out_specs=(
            pl.BlockSpec((1, 1, l, l), lambda bi, hi: (bi, hi, 0, 0)),
            pl.BlockSpec((1, 1, l, head_dim), lambda bi, hi: (bi, hi, 0, 0)),
        ),
        compiler_params=pltpu.CompilerParams(
            dimension_semantics=("parallel", "parallel"),
            vmem_limit_bytes=48 * 1024 * 1024,
        ),
    )(lam, qh, kh, vh)

    # --- merge heads + output projection ---
    o = o_heads.transpose(0, 2, 1, 3).reshape(b, l, e).astype(x.dtype)
    out = linear_nobias(o.reshape(b * l, e), params["wo"]).reshape(b, l, e)
    # resid_dropout / attn_dropout are identity (eval / p=0)
    return out, attn_w


# ----------------------------------------------------------------------------
# Pure-JAX reference (for verification)
# ----------------------------------------------------------------------------
def reference_forward(x, params, n_head, layer_idx=0):
    b, l, e = x.shape
    head_dim = e // n_head
    d2 = head_dim // 2
    lambda_init = lambda_init_fn(layer_idx)
    scaling = math.sqrt(head_dim // 2)

    q = x @ params["wq"].T
    k = x @ params["wk"].T
    v = x @ params["wv"].T
    qh = q.reshape(b, l, 2 * n_head, d2).transpose(0, 2, 1, 3)
    kh = k.reshape(b, l, 2 * n_head, d2).transpose(0, 2, 1, 3)
    vh = v.reshape(b, l, n_head, head_dim).transpose(0, 2, 1, 3)

    a = jnp.einsum("bhqd,bhkd->bhqk", qh, kh) / scaling
    mask = jnp.tril(jnp.ones((l, l), dtype=bool))
    a = jnp.where(mask, a, jnp.finfo(jnp.float32).min)
    a = jax.nn.softmax(a, axis=-1)

    lam = (jnp.exp(jnp.sum(params["lq1"] * params["lk1"]))
           - jnp.exp(jnp.sum(params["lq2"] * params["lk2"]))
           + lambda_init)
    a = a.reshape(b, n_head, 2, l, l)
    a = a[:, :, 0] - lam * a[:, :, 1]

    o = jnp.einsum("bhqk,bhkd->bhqd", a, vh)
    ms = jnp.mean(o * o, axis=-1, keepdims=True) + 1e-5
    o = o * jax.lax.rsqrt(ms)
    o = o * (1.0 - lambda_init)
    o = o.transpose(0, 2, 1, 3).reshape(b, l, e)
    o = o @ params["wo"].T
    return o, a


# ----------------------------------------------------------------------------
if __name__ == "__main__":
    # Small shapes consistent with the module:
    #   batch=2, seq=8 (== max_position_embeddings), n_embd=32, n_head=4
    B, L, E, H = 2, 8, 32, 4
    head_dim = E // H
    d2 = head_dim // 2
    layer_idx = 0

    key = jax.random.PRNGKey(0)
    keys = jax.random.split(key, 9)
    params = {
        "wq": 0.05 * jax.random.normal(keys[0], (E, E), jnp.float32),
        "wk": 0.05 * jax.random.normal(keys[1], (E, E), jnp.float32),
        "wv": 0.05 * jax.random.normal(keys[2], (E, E), jnp.float32),
        "wo": 0.05 * jax.random.normal(keys[3], (E, E), jnp.float32),
        "lq1": 0.1 * jax.random.normal(keys[4], (d2,), jnp.float32),
        "lk1": 0.1 * jax.random.normal(keys[5], (d2,), jnp.float32),
        "lq2": 0.1 * jax.random.normal(keys[6], (d2,), jnp.float32),
        "lk2": 0.1 * jax.random.normal(keys[7], (d2,), jnp.float32),
    }
    x = jax.random.normal(keys[8], (B, L, E), jnp.float32)

    fwd = jax.jit(functools.partial(
        casual_multihead_diff_attn, n_head=H, layer_idx=layer_idx))
    out, attn = fwd(x, params)
    out = jax.block_until_ready(out)
    attn = jax.block_until_ready(attn)

    ref_out, ref_attn = reference_forward(x, params, n_head=H, layer_idx=layer_idx)
    ref_out = jax.block_until_ready(ref_out)
    ref_attn = jax.block_until_ready(ref_attn)

    assert out.shape == (B, L, E) and attn.shape == (B, H, L, L)
    assert bool(jnp.all(jnp.isfinite(out))) and bool(jnp.all(jnp.isfinite(attn)))
    # bf16 MXU operands (f32 accumulation) -> slightly looser tolerance than pure f32.
    assert bool(jnp.allclose(attn, ref_attn, rtol=2e-2, atol=2e-2))
    assert bool(jnp.allclose(out, ref_out, rtol=2e-2, atol=2e-2))

    print("KERNEL_OK")
</pallas_src>

<mosaic_0001>
module attributes {stable_mosaic.version = 11 : i64} {
  func.func @_linear_kernel(%arg0: i32, %arg1: i32, %arg2: i32, %arg3: memref<16x32xf32, #tpu.memory_space<vmem>>, %arg4: memref<32x32xf32, #tpu.memory_space<vmem>>, %arg5: memref<16x32xf32, #tpu.memory_space<vmem>>, %arg6: memref<16x32xf32, #tpu.memory_space<vmem>>) attributes {dimension_semantics = [#tpu.dimension_semantics<parallel>, #tpu.dimension_semantics<parallel>, #tpu.dimension_semantics<arbitrary>], iteration_bounds = array<i64: 1, 1, 1>, scalar_prefetch = 0 : i64, scratch_operands = 1 : i64, tpu.core_type = #tpu.core_type<tc>, window_params = [{transform_indices = @transform_0, window_bounds = array<i64: 16, 32>}, {transform_indices = @transform_1, window_bounds = array<i64: 32, 32>}, {transform_indices = @transform_2, window_bounds = array<i64: 16, 32>}]} {
    %c0_i32 = arith.constant 0 : i32
    %0 = arith.cmpi eq, %arg2, %c0_i32 : i32
    %1 = arith.extui %0 : i1 to i32
    %c0_i32_0 = arith.constant 0 : i32
    %2 = arith.cmpi ne, %1, %c0_i32_0 : i32
    scf.if %2 {
      %cst_10 = arith.constant 0.000000e+00 : f32
      %14 = vector.broadcast %cst_10 : f32 to vector<16x32xf32>
      %c0_11 = arith.constant 0 : index
      %c0_12 = arith.constant 0 : index
      %15 = vector.load %arg6[%c0_11, %c0_12] : memref<16x32xf32, #tpu.memory_space<vmem>>, vector<16x32xf32>
      tpu.vector_store %arg6[%c0_11, %c0_12], %14 {strides = array<i32>} : memref<16x32xf32, #tpu.memory_space<vmem>>, vector<16x32xf32>,
    } else {
    }
    %c0 = arith.constant 0 : index
    %c0_1 = arith.constant 0 : index
    %3 = vector.load %arg6[%c0, %c0_1] : memref<16x32xf32, #tpu.memory_space<vmem>>, vector<16x32xf32>
    %c0_2 = arith.constant 0 : index
    %c0_3 = arith.constant 0 : index
    %4 = vector.load %arg3[%c0_2, %c0_3] : memref<16x32xf32, #tpu.memory_space<vmem>>, vector<16x32xf32>
    %5 = arith.truncf %4 : vector<16x32xf32> to vector<16x32xbf16>
    %c0_4 = arith.constant 0 : index
    %c0_5 = arith.constant 0 : index
    %6 = vector.load %arg4[%c0_4, %c0_5] : memref<32x32xf32, #tpu.memory_space<vmem>>, vector<32x32xf32>
    %7 = arith.truncf %6 : vector<32x32xf32> to vector<32x32xbf16>
    %cst = arith.constant dense<0.000000e+00> : vector<16x32xf32>
    %8 = tpu.matmul %5, %7, %cst {dimension_numbers = #tpu.dot_dimension_numbers<[1], [1], [0], [0], [0, 0, 1, 0], [], []>} : vector<16x32xbf16>, vector<32x32xbf16>, vector<16x32xf32> -> vector<16x32xf32>
    %9 = arith.addf %3, %8 : vector<16x32xf32>
    %c0_6 = arith.constant 0 : index
    %c0_7 = arith.constant 0 : index
    %10 = vector.load %arg6[%c0_6, %c0_7] : memref<16x32xf32, #tpu.memory_space<vmem>>, vector<16x32xf32>
    tpu.vector_store %arg6[%c0_6, %c0_7], %9 {strides = array<i32>} : memref<16x32xf32, #tpu.memory_space<vmem>>, vector<16x32xf32>,
    %c0_i32_8 = arith.constant 0 : i32
    %11 = arith.cmpi eq, %arg2, %c0_i32_8 : i32
    %12 = arith.extui %11 : i1 to i32
    %c0_i32_9 = arith.constant 0 : i32
    %13 = arith.cmpi ne, %12, %c0_i32_9 : i32
    scf.if %13 {
      %c0_10 = arith.constant 0 : index
      %c0_11 = arith.constant 0 : index
      %14 = vector.load %arg6[%c0_10, %c0_11] : memref<16x32xf32, #tpu.memory_space<vmem>>, vector<16x32xf32>
      %c0_12 = arith.constant 0 : index
      %c0_13 = arith.constant 0 : index
      %15 = vector.load %arg5[%c0_12, %c0_13] : memref<16x32xf32, #tpu.memory_space<vmem>>, vector<16x32xf32>
      tpu.vector_store %arg5[%c0_12, %c0_13], %14 {strides = array<i32>} : memref<16x32xf32, #tpu.memory_space<vmem>>, vector<16x32xf32>,
    } else {
    }
    return
  }
  func.func @transform_0(%arg0: i32, %arg1: i32, %arg2: i32) -> (i32, i32) {
    %c0_i32 = arith.constant 0 : i32
    return %arg0, %arg2 : i32, i32
  }
  func.func @transform_1(%arg0: i32, %arg1: i32, %arg2: i32) -> (i32, i32) {
    %c0_i32 = arith.constant 0 : i32
    return %arg1, %arg2 : i32, i32
  }
  func.func @transform_2(%arg0: i32, %arg1: i32, %arg2: i32) -> (i32, i32) {
    %c0_i32 = arith.constant 0 : i32
    return %arg0, %arg1 : i32, i32
  }
}

module attributes {stable_mosaic.version = 11 : i64} {
  func.func @_linear_kernel(%arg0: i32, %arg1: i32, %arg2: i32, %arg3: memref<16x32xf32, #tpu.memory_space<vmem>>, %arg4: memref<32x32xf32, #tpu.memory_space<vmem>>, %arg5: memref<16x32xf32, #tpu.memory_space<vmem>>, %arg6: memref<16x32xf32, #tpu.memory_space<vmem>>) attributes {dimension_semantics = [#tpu.dimension_semantics<parallel>, #tpu.dimension_semantics<parallel>, #tpu.dimension_semantics<arbitrary>], iteration_bounds = array<i64: 1, 1, 1>, scalar_prefetch = 0 : i64, scratch_operands = 1 : i64, tpu.core_type = #tpu.core_type<tc>, window_params = [{transform_indices = @transform_0, window_bounds = array<i64: 16, 32>}, {transform_indices = @transform_1, window_bounds = array<i64: 32, 32>}, {transform_indices = @transform_2, window_bounds = array<i64: 16, 32>}]} {
    %c0_i32 = arith.constant 0 : i32
    %0 = arith.cmpi eq, %arg2, %c0_i32 : i32
    %1 = arith.extui %0 : i1 to i32
    %c0_i32_0 = arith.constant 0 : i32
    %2 = arith.cmpi ne, %1, %c0_i32_0 : i32
    scf.if %2 {
      %cst_10 = arith.constant 0.000000e+00 : f32
      %14 = vector.broadcast %cst_10 : f32 to vector<16x32xf32>
      %c0_11 = arith.constant 0 : index
      %c0_12 = arith.constant 0 : index
      %15 = vector.load %arg6[%c0_11, %c0_12] : memref<16x32xf32, #tpu.memory_space<vmem>>, vector<16x32xf32>
      tpu.vector_store %arg6[%c0_11, %c0_12], %14 {strides = array<i32>} : memref<16x32xf32, #tpu.memory_space<vmem>>, vector<16x32xf32>,
    } else {
    }
    %c0 = arith.constant 0 : index
    %c0_1 = arith.constant 0 : index
    %3 = vector.load %arg6[%c0, %c0_1] : memref<16x32xf32, #tpu.memory_space<vmem>>, vector<16x32xf32>
    %c0_2 = arith.constant 0 : index
    %c0_3 = arith.constant 0 : index
    %4 = vector.load %arg3[%c0_2, %c0_3] : memref<16x32xf32, #tpu.memory_space<vmem>>, vector<16x32xf32>
    %5 = arith.truncf %4 : vector<16x32xf32> to vector<16x32xbf16>
    %c0_4 = arith.constant 0 : index
    %c0_5 = arith.constant 0 : index
    %6 = vector.load %arg4[%c0_4, %c0_5] : memref<32x32xf32, #tpu.memory_space<vmem>>, vector<32x32xf32>
    %7 = arith.truncf %6 : vector<32x32xf32> to vector<32x32xbf16>
    %cst = arith.constant dense<0.000000e+00> : vector<16x32xf32>
    %8 = tpu.matmul %5, %7, %cst {dimension_numbers = #tpu.dot_dimension_numbers<[1], [1], [0], [0], [0, 0, 1, 0], [], []>} : vector<16x32xbf16>, vector<32x32xbf16>, vector<16x32xf32> -> vector<16x32xf32>
    %9 = arith.addf %3, %8 : vector<16x32xf32>
    %c0_6 = arith.constant 0 : index
    %c0_7 = arith.constant 0 : index
    %10 = vector.load %arg6[%c0_6, %c0_7] : memref<16x32xf32, #tpu.memory_space<vmem>>, vector<16x32xf32>
    tpu.vector_store %arg6[%c0_6, %c0_7], %9 {strides = array<i32>} : memref<16x32xf32, #tpu.memory_space<vmem>>, vector<16x32xf32>,
    %c0_i32_8 = arith.constant 0 : i32
    %11 = arith.cmpi eq, %arg2, %c0_i32_8 : i32
    %12 = arith.extui %11 : i1 to i32
    %c0_i32_9 = arith.constant 0 : i32
    %13 = arith.cmpi ne, %12, %c0_i32_9 : i32
    scf.if %13 {
      %c0_10 = arith.constant 0 : index
      %c0_11 = arith.constant 0 : index
      %14 = vector.load %arg6[%c0_10, %c0_11] : memref<16x32xf32, #tpu.memory_space<vmem>>, vector<16x32xf32>
      %c0_12 = arith.constant 0 : index
      %c0_13 = arith.constant 0 : index
      %15 = vector.load %arg5[%c0_12, %c0_13] : memref<16x32xf32, #tpu.memory_space<vmem>>, vector<16x32xf32>
      tpu.vector_store %arg5[%c0_12, %c0_13], %14 {strides = array<i32>} : memref<16x32xf32, #tpu.memory_space<vmem>>, vector<16x32xf32>,
    } else {
    }
    return
  }
  func.func @transform_0(%arg0: i32, %arg1: i32, %arg2: i32) -> (i32, i32) {
    %c0_i32 = arith.constant 0 : i32
    return %arg0, %arg2 : i32, i32
  }
  func.func @transform_1(%arg0: i32, %arg1: i32, %arg2: i32) -> (i32, i32) {
    %c0_i32 = arith.constant 0 : i32
    return %arg1, %arg2 : i32, i32
  }
  func.func @transform_2(%arg0: i32, %arg1: i32, %arg2: i32) -> (i32, i32) {
    %c0_i32 = arith.constant 0 : i32
    return %arg0, %arg1 : i32, i32
  }
}

module attributes {stable_mosaic.version = 11 : i64} {
  func.func @_diff_attn_kernel(%arg0: i32, %arg1: i32, %arg2: memref<1x1xf32, #tpu.memory_space<smem>>, %arg3: memref<1x2x8x4xf32, #tpu.memory_space<vmem>>, %arg4: memref<1x2x8x4xf32, #tpu.memory_space<vmem>>, %arg5: memref<1x1x8x8xf32, #tpu.memory_space<vmem>>, %arg6: memref<1x1x8x8xf32, #tpu.memory_space<vmem>>, %arg7: memref<1x1x8x8xf32, #tpu.memory_space<vmem>>) attributes {dimension_semantics = [#tpu.dimension_semantics<parallel>, #tpu.dimension_semantics<parallel>], iteration_bounds = array<i64: 2, 4>, scalar_prefetch = 0 : i64, scratch_operands = 0 : i64, tpu.core_type = #tpu.core_type<tc>, window_params = [{transform_indices = @transform_0, window_bounds = array<i64: 1, 1>}, {transform_indices = @transform_1, window_bounds = array<i64: 1, 2, 8, 4>}, {transform_indices = @transform_2, window_bounds = array<i64: 1, 2, 8, 4>}, {transform_indices = @transform_3, window_bounds = array<i64: 1, 1, 8, 8>}, {transform_indices = @transform_4, window_bounds = array<i64: 1, 1, 8, 8>}, {transform_indices = @transform_5, window_bounds = array<i64: 1, 1, 8, 8>}]} {
    %c0 = arith.constant 0 : index
    %c0_0 = arith.constant 0 : index
    %c0_1 = arith.constant 0 : index
    %c0_2 = arith.constant 0 : index
    %0 = vector.load %arg3[%c0, %c0_0, %c0_1, %c0_2] : memref<1x2x8x4xf32, #tpu.memory_space<vmem>>, vector<1x2x8x4xf32>
    %1 = vector.shape_cast %0 : vector<1x2x8x4xf32> to vector<2x8x4xf32>
    %cst = arith.constant 5.000000e-01 : f32
    %2 = vector.broadcast %cst : f32 to vector<2x8x4xf32>
    %3 = arith.mulf %1, %2 : vector<2x8x4xf32>
    %c0_3 = arith.constant 0 : index
    %c0_4 = arith.constant 0 : index
    %c0_5 = arith.constant 0 : index
    %c0_6 = arith.constant 0 : index
    %4 = vector.load %arg4[%c0_3, %c0_4, %c0_5, %c0_6] : memref<1x2x8x4xf32, #tpu.memory_space<vmem>>, vector<1x2x8x4xf32>
    %5 = vector.shape_cast %4 : vector<1x2x8x4xf32> to vector<2x8x4xf32>
    %c0_7 = arith.constant 0 : index
    %c0_8 = arith.constant 0 : index
    %c0_9 = arith.constant 0 : index
    %c0_10 = arith.constant 0 : index
    %6 = vector.load %arg5[%c0_7, %c0_8, %c0_9, %c0_10] : memref<1x1x8x8xf32, #tpu.memory_space<vmem>>, vector<1x1x8x8xf32>
    %7 = vector.shape_cast %6 : vector<1x1x8x8xf32> to vector<8x8xf32>
    %8 = arith.truncf %3 : vector<2x8x4xf32> to vector<2x8x4xbf16>
    %9 = arith.truncf %5 : vector<2x8x4xf32> to vector<2x8x4xbf16>
    %cst_11 = arith.constant dense<0.000000e+00> : vector<2x8x8xf32>
    %10 = tpu.matmul %8, %9, %cst_11 {dimension_numbers = #tpu.dot_dimension_numbers<[2], [2], [1], [1], [0, 0, 0, 1, 1, 1], [0], [0]>} : vector<2x8x4xbf16>, vector<2x8x4xbf16>, vector<2x8x8xf32> -> vector<2x8x8xf32>
    %11 = tpu.iota {dimensions = array<i32: 0>} : vector<8x8xi32>
    %12 = tpu.iota {dimensions = array<i32: 1>} : vector<8x8xi32>
    %13 = arith.cmpi sge, %11, %12 : vector<8x8xi32>
    %14 = vector.shape_cast %13 : vector<8x8xi1> to vector<1x8x8xi1>
    %cst_12 = arith.constant -3.40282347E+38 : f32
    %15 = vector.shape_cast %14 : vector<1x8x8xi1> to vector<1x8x8xi1>
    %16 = vector.broadcast %15 : vector<1x8x8xi1> to vector<2x8x8xi1>
    %17 = vector.broadcast %cst_12 : f32 to vector<2x8x8xf32>
    %18 = arith.select %16, %10, %17 : vector<2x8x8xi1>, vector<2x8x8xf32>
    %cst_13 = arith.constant dense<0xFF800000> : vector<2x8xf32>
    %19 = vector.multi_reduction <maximumf>, %18, %cst_13 [2] : vector<2x8x8xf32> to vector<2x8xf32>
    %20 = vector.shape_cast %19 : vector<2x8xf32> to vector<2x8x1xf32>
    %21 = vector.broadcast %20 : vector<2x8x1xf32> to vector<2x8x8xf32>
    %22 = arith.subf %18, %21 : vector<2x8x8xf32>
    %23 = math.exp %22 : vector<2x8x8xf32>
    %cst_14 = arith.constant dense<0.000000e+00> : vector<2x8xf32>
    %24 = vector.multi_reduction <add>, %23, %cst_14 [2] : vector<2x8x8xf32> to vector<2x8xf32>
    %25 = vector.shape_cast %24 : vector<2x8xf32> to vector<2x8x1xf32>
    %26 = tpu.reciprocal %25 {approx = true} : vector<2x8x1xf32> -> vector<2x8x1xf32>
    %27 = vector.broadcast %26 : vector<2x8x1xf32> to vector<2x8x8xf32>
    %28 = arith.mulf %23, %27 : vector<2x8x8xf32>
    %c0_15 = arith.constant 0 : index
    %c0_16 = arith.constant 0 : index
    %29 = memref.load %arg2[%c0_15, %c0_16] : memref<1x1xf32, #tpu.memory_space<smem>>
    %30 = vector.extract_strided_slice %28 {offsets = [0, 0, 0], sizes = [1, 8, 8], strides = [1, 1, 1]} : vector<2x8x8xf32> to vector<1x8x8xf32>
    %31 = vector.shape_cast %30 : vector<1x8x8xf32> to vector<8x8xf32>
    %32 = vector.extract_strided_slice %28 {offsets = [1, 0, 0], sizes = [1, 8, 8], strides = [1, 1, 1]} : vector<2x8x8xf32> to vector<1x8x8xf32>
    %33 = vector.shape_cast %32 : vector<1x8x8xf32> to vector<8x8xf32>
    %34 = vector.broadcast %29 : f32 to vector<8x8xf32>
    %35 = arith.mulf %34, %33 : vector<8x8xf32>
    %36 = arith.subf %31, %35 : vector<8x8xf32>
    %c0_17 = arith.constant 0 : index
    %c0_18 = arith.constant 0 : index
    %c0_19 = arith.constant 0 : index
    %c0_20 = arith.constant 0 : index
    %37 = vector.load %arg6[%c0_17, %c0_18, %c0_19, %c0_20] : memref<1x1x8x8xf32, #tpu.memory_space<vmem>>, vector<1x1x8x8xf32>
    %38 = vector.shape_cast %37 : vector<1x1x8x8xf32> to vector<8x8xf32>
    %39 = vector.shape_cast %36 : vector<8x8xf32> to vector<1x1x8x8xf32>
    tpu.vector_store %arg6[%c0_17, %c0_18, %c0_19, %c0_20], %39 {strides = array<i32>} : memref<1x1x8x8xf32, #tpu.memory_space<vmem>>, vector<1x1x8x8xf32>,
    %40 = arith.truncf %36 : vector<8x8xf32> to vector<8x8xbf16>
    %41 = arith.truncf %7 : vector<8x8xf32> to vector<8x8xbf16>
    %cst_21 = arith.constant dense<0.000000e+00> : vector<8x8xf32>
    %42 = tpu.matmul %40, %41, %cst_21 {dimension_numbers = #tpu.dot_dimension_numbers<[1], [0], [0], [1], [0, 0, 1, 1], [], []>} : vector<8x8xbf16>, vector<8x8xbf16>, vector<8x8xf32> -> vector<8x8xf32>
    %43 = arith.mulf %42, %42 : vector<8x8xf32>
    %cst_22 = arith.constant dense<0.000000e+00> : vector<8xf32>
    %44 = vector.multi_reduction <add>, %43, %cst_22 [1] : vector<8x8xf32> to vector<8xf32>
    %45 = vector.shape_cast %44 : vector<8xf32> to vector<8x1xf32>
    %cst_23 = arith.constant 8.000000e+00 : f32
    %46 = vector.broadcast %cst_23 : f32 to vector<8x1xf32>
    %47 = arith.divf %45, %46 : vector<8x1xf32>
    %cst_24 = arith.constant 9.99999974E-6 : f32
    %48 = vector.broadcast %cst_24 : f32 to vector<8x1xf32>
    %49 = arith.addf %47, %48 : vector<8x1xf32>
    %50 = math.rsqrt %49 : vector<8x1xf32>
    %51 = vector.broadcast %50 : vector<8x1xf32> to vector<8x8xf32>
    %52 = arith.mulf %42, %51 : vector<8x8xf32>
    %cst_25 = arith.constant 8.000000e-01 : f32
    %53 = vector.broadcast %cst_25 : f32 to vector<8x8xf32>
    %54 = arith.mulf %52, %53 : vector<8x8xf32>
    %c0_26 = arith.constant 0 : index
    %c0_27 = arith.constant 0 : index
    %c0_28 = arith.constant 0 : index
    %c0_29 = arith.constant 0 : index
    %55 = vector.load %arg7[%c0_26, %c0_27, %c0_28, %c0_29] : memref<1x1x8x8xf32, #tpu.memory_space<vmem>>, vector<1x1x8x8xf32>
    %56 = vector.shape_cast %55 : vector<1x1x8x8xf32> to vector<8x8xf32>
    %57 = vector.shape_cast %54 : vector<8x8xf32> to vector<1x1x8x8xf32>
    tpu.vector_store %arg7[%c0_26, %c0_27, %c0_28, %c0_29], %57 {strides = array<i32>} : memref<1x1x8x8xf32, #tpu.memory_space<vmem>>, vector<1x1x8x8xf32>,
    return
  }
  func.func @transform_0(%arg0: i32, %arg1: i32) -> (i32, i32) {
    %c0_i32 = arith.constant 0 : i32
    %c0_i32_0 = arith.constant 0 : i32
    %c0_i32_1 = arith.constant 0 : i32
    return %c0_i32, %c0_i32_0 : i32, i32
  }
  func.func @transform_1(%arg0: i32, %arg1: i32) -> (i32, i32, i32, i32) {
    %c0_i32 = arith.constant 0 : i32
    %c0_i32_0 = arith.constant 0 : i32
    %c0_i32_1 = arith.constant 0 : i32
    return %arg0, %arg1, %c0_i32, %c0_i32_0 : i32, i32, i32, i32
  }
  func.func @transform_2(%arg0: i32, %arg1: i32) -> (i32, i32, i32, i32) {
    %c0_i32 = arith.constant 0 : i32
    %c0_i32_0 = arith.constant 0 : i32
    %c0_i32_1 = arith.constant 0 : i32
    return %arg0, %arg1, %c0_i32, %c0_i32_0 : i32, i32, i32, i32
  }
  func.func @transform_3(%arg0: i32, %arg1: i32) -> (i32, i32, i32, i32) {
    %c0_i32 = arith.constant 0 : i32
    %c0_i32_0 = arith.constant 0 : i32
    %c0_i32_1 = arith.constant 0 : i32
    return %arg0, %arg1, %c0_i32, %c0_i32_0 : i32, i32, i32, i32
  }
  func.func @transform_4(%arg0: i32, %arg1: i32) -> (i32, i32, i32, i32) {
    %c0_i32 = arith.constant 0 : i32
    %c0_i32_0 = arith.constant 0 : i32
    %c0_i32_1 = arith.constant 0 : i32
    return %arg0, %arg1, %c0_i32, %c0_i32_0 : i32, i32, i32, i32
  }
  func.func @transform_5(%arg0: i32, %arg1: i32) -> (i32, i32, i32, i32) {
    %c0_i32 = arith.constant 0 : i32
    %c0_i32_0 = arith.constant 0 : i32
    %c0_i32_1 = arith.constant 0 : i32
    return %arg0, %arg1, %c0_i32, %c0_i32_0 : i32, i32, i32, i32
  }
}

module attributes {stable_mosaic.version = 11 : i64} {
  func.func @_linear_kernel(%arg0: i32, %arg1: i32, %arg2: i32, %arg3: memref<16x32xf32, #tpu.memory_space<vmem>>, %arg4: memref<32x32xf32, #tpu.memory_space<vmem>>, %arg5: memref<16x32xf32, #tpu.memory_space<vmem>>, %arg6: memref<16x32xf32, #tpu.memory_space<vmem>>) attributes {dimension_semantics = [#tpu.dimension_semantics<parallel>, #tpu.dimension_semantics<parallel>, #tpu.dimension_semantics<arbitrary>], iteration_bounds = array<i64: 1, 1, 1>, scalar_prefetch = 0 : i64, scratch_operands = 1 : i64, tpu.core_type = #tpu.core_type<tc>, window_params = [{transform_indices = @transform_0, window_bounds = array<i64: 16, 32>}, {transform_indices = @transform_1, window_bounds = array<i64: 32, 32>}, {transform_indices = @transform_2, window_bounds = array<i64: 16, 32>}]} {
    %c0_i32 = arith.constant 0 : i32
    %0 = arith.cmpi eq, %arg2, %c0_i32 : i32
    %1 = arith.extui %0 : i1 to i32
    %c0_i32_0 = arith.constant 0 : i32
    %2 = arith.cmpi ne, %1, %c0_i32_0 : i32
    scf.if %2 {
      %cst_10 = arith.constant 0.000000e+00 : f32
      %14 = vector.broadcast %cst_10 : f32 to vector<16x32xf32>
      %c0_11 = arith.constant 0 : index
      %c0_12 = arith.constant 0 : index
      %15 = vector.load %arg6[%c0_11, %c0_12] : memref<16x32xf32, #tpu.memory_space<vmem>>, vector<16x32xf32>
      tpu.vector_store %arg6[%c0_11, %c0_12], %14 {strides = array<i32>} : memref<16x32xf32, #tpu.memory_space<vmem>>, vector<16x32xf32>,
    } else {
    }
    %c0 = arith.constant 0 : index
    %c0_1 = arith.constant 0 : index
    %3 = vector.load %arg6[%c0, %c0_1] : memref<16x32xf32, #tpu.memory_space<vmem>>, vector<16x32xf32>
    %c0_2 = arith.constant 0 : index
    %c0_3 = arith.constant 0 : index
    %4 = vector.load %arg3[%c0_2, %c0_3] : memref<16x32xf32, #tpu.memory_space<vmem>>, vector<16x32xf32>
    %5 = arith.truncf %4 : vector<16x32xf32> to vector<16x32xbf16>
    %c0_4 = arith.constant 0 : index
    %c0_5 = arith.constant 0 : index
    %6 = vector.load %arg4[%c0_4, %c0_5] : memref<32x32xf32, #tpu.memory_space<vmem>>, vector<32x32xf32>
    %7 = arith.truncf %6 : vector<32x32xf32> to vector<32x32xbf16>
    %cst = arith.constant dense<0.000000e+00> : vector<16x32xf32>
    %8 = tpu.matmul %5, %7, %cst {dimension_numbers = #tpu.dot_dimension_numbers<[1], [1], [0], [0], [0, 0, 1, 0], [], []>} : vector<16x32xbf16>, vector<32x32xbf16>, vector<16x32xf32> -> vector<16x32xf32>
    %9 = arith.addf %3, %8 : vector<16x32xf32>
    %c0_6 = arith.constant 0 : index
    %c0_7 = arith.constant 0 : index
    %10 = vector.load %arg6[%c0_6, %c0_7] : memref<16x32xf32, #tpu.memory_space<vmem>>, vector<16x32xf32>
    tpu.vector_store %arg6[%c0_6, %c0_7], %9 {strides = array<i32>} : memref<16x32xf32, #tpu.memory_space<vmem>>, vector<16x32xf32>,
    %c0_i32_8 = arith.constant 0 : i32
    %11 = arith.cmpi eq, %arg2, %c0_i32_8 : i32
    %12 = arith.extui %11 : i1 to i32
    %c0_i32_9 = arith.constant 0 : i32
    %13 = arith.cmpi ne, %12, %c0_i32_9 : i32
    scf.if %13 {
      %c0_10 = arith.constant 0 : index
      %c0_11 = arith.constant 0 : index
      %14 = vector.load %arg6[%c0_10, %c0_11] : memref<16x32xf32, #tpu.memory_space<vmem>>, vector<16x32xf32>
      %c0_12 = arith.constant 0 : index
      %c0_13 = arith.constant 0 : index
      %15 = vector.load %arg5[%c0_12, %c0_13] : memref<16x32xf32, #tpu.memory_space<vmem>>, vector<16x32xf32>
      tpu.vector_store %arg5[%c0_12, %c0_13], %14 {strides = array<i32>} : memref<16x32xf32, #tpu.memory_space<vmem>>, vector<16x32xf32>,
    } else {
    }
    return
  }
  func.func @transform_0(%arg0: i32, %arg1: i32, %arg2: i32) -> (i32, i32) {
    %c0_i32 = arith.constant 0 : i32
    return %arg0, %arg2 : i32, i32
  }
  func.func @transform_1(%arg0: i32, %arg1: i32, %arg2: i32) -> (i32, i32) {
    %c0_i32 = arith.constant 0 : i32
    return %arg1, %arg2 : i32, i32
  }
  func.func @transform_2(%arg0: i32, %arg1: i32, %arg2: i32) -> (i32, i32) {
    %c0_i32 = arith.constant 0 : i32
    return %arg0, %arg1 : i32, i32
  }
}

</mosaic_0001>

<bundles_post_ra>
// kernel: casual_multihead_diff_attn.6
= control target key start
LH: loop header
LB: loop body
LE: loop exit
PB: predicated region body
PF: predicated region fallthrough
CT: control target
= control target key end

     0   :  { %vm16_vm0 = vcmask 261120   ;;  %v110_v0 = vmov 0.0   ;;  %vm111_vm1 = vmmov 0   ;;  %s160_s1 = inlined_call_operand.vmem [shape: f32[32,32], index: 1, kind: input, shape index: {}]   ;;  %s161_s0 = inlined_call_operand.vmem [shape: f32[16,32], index: 0, kind: input, shape index: {}]   ;;  %s162_s2 = inlined_call_operand.vmem [shape: f32[16,32], index: 2, kind: output, shape index: {}]  }
   0x1   :  { %100 = vmatprep.subr.bf16.mxu0 %v110_v0  ;;  %v26_v1 = vld [vmem:[%s160_s1 + $0x10] sm:$0xff]  ;;  %v27_v2 = vld [vmem:[%s160_s1 + $0x18] sm:$0xff]  ;;  %17 = vst.msk [vmem:[#allocation2] sm:$0xff] %vm16_vm0, %v110_v0  ;;  %18 = vst.msk [vmem:[#allocation2 + $0x8] sm:$0xff] %vm16_vm0, %v110_v0  ;;  %104 = vmatprep.mubr.msk.bf16.mxu0 %vm111_vm1, %v110_v0 }
   0x2   :  { %v29_v3 = vpack.c.bf16 %v27_v2, %v26_v1  ;;  %v24_v4 = vld [vmem:[%s160_s1] sm:$0xff]  ;;  %v25_v5 = vld [vmem:[%s160_s1 + $0x8] sm:$0xff] }
   0x3   :  { %v28_v7 = vpack.c.bf16 %v25_v5, %v24_v4  ;;  %v21_v9 = vld [vmem:[%s161_s0] sm:$0xff]  ;;  %v22_v10 = vld [vmem:[%s161_s0 + $0x8] sm:$0xff] }
   0x4   :  { %v38_v6 = vsel %vm16_vm0, %v29_v3, 0  ;;  %v23_v11 = vpack.c.bf16 %v22_v10, %v21_v9 }
   0x5   :  { %101 = vmatpush3.bf16.xpose.msra.mxu0 %v38_v6  ;;  %v35_v8 = vsel %vm16_vm0, %v28_v7, 0 }
   0x6   :  { %102 = vmatprep.subr.bf16.mxu0 %v110_v0 }
   0x8   :  { %v19_v12 = vld [vmem:[#allocation2] sm:$0xff]  ;;  %v20_v16 = vld [vmem:[#allocation2 + $0x8] sm:$0xff] }
   0xd   :  { %103 = vmatpush3.bf16.xpose.msra.mxu0 %v35_v8 }
  0x14   :  { %105 = vmatmul.mubr.msk.bf16.vlgmr.msra.gmra.mxu0 %vm16_vm0, %v23_v11 }
  0xd4   :  { %v74_v13 = vpop.f32.mrf.mxu0 }
  0xd5   :  { %v81_v14 = vadd.f32 %v74_v13, %v19_v12 }
  0xd6   :  { %v106_v15 = vpop.f32.mrf.mxu0 }
  0xd7   :  { %83 = vst.msk [vmem:[#allocation2] sm:$0xff] %vm16_vm0, %v81_v14 }
  0xd8   :  { %v77_v17 = vpop.f32.mrf.mxu0 }
  0xd9   :  { %v82_v18 = vadd.f32 %v77_v17, %v20_v16 }
  0xda   :  { %v107_v19 = vpop.f32.mrf.mxu0 }
  0xdb   :  { %84 = vst.msk [vmem:[#allocation2 + $0x8] sm:$0xff] %vm16_vm0, %v82_v18 }
  0xde   :  { %v88_v20 = vld [vmem:[#allocation2] sm:$0xff] }
  0xdf   :  { %90 = vst.msk [vmem:[%s162_s2] sm:$0xff] %vm16_vm0, %v88_v20 }
  0xe2   :  { %v89_v21 = vld [vmem:[#allocation2 + $0x8] sm:$0xff] }
  0xe3   :  { %91 = vst.msk [vmem:[%s162_s2 + $0x8] sm:$0xff] %vm16_vm0, %v89_v21 }

// kernel: casual_multihead_diff_attn.7
= control target key start
LH: loop header
LB: loop body
LE: loop exit
PB: predicated region body
PF: predicated region fallthrough
CT: control target
= control target key end

     0   :  { %7 = vsyncpa [#allocation4], 0  ;;  %s150_s9 = smov [#allocation3]   ;;  %s194_s0 = inlined_call_operand.vmem [shape: f32[16,32], index: 0, kind: input, shape index: {}]   ;;  %s195_s1 = inlined_call_operand.hbm [shape: f32[32,32], index: 1, kind: input, shape index: {}]   ;;  %s196_s2 = inlined_call_operand.vmem [shape: f32[16,32], index: 2, kind: output, shape index: {}]  }
   0x1   :  { %s15_s10 = sshll.u32 %s150_s9, 4  ;;  %s16_s10 = int_to_ptr.vmem [resolvable:$true] %s15_s10 }
   0x2   :  { %s136_s11 = scalar_lea.vmem %s16_s10, 512  ;;  %p141_p1 = scmp.lt.s32.totalorder %s16_s10, %s16_s10 }
   0x3   :  { %p137_p0 = scmp.ne.s32.totalorder %s16_s10, %s136_s11  ;;  %p142_p2 = scmp.lt.s32.totalorder %s136_s11, %s136_s11 }
   0x5   :  { %p143_p3 = por %p142_p2, %p141_p1 }
   0x7   :  { %p144_p4 = pnand %p143_p3, %p137_p0 }
   0x9   :  { %147 = shalt.err (!%p144_p4)
}
   0xa   :  { %s151_s12 = smov 128   ;;  %s152_s13 = smov 8  }
   0xb   :  { %21 = dma.hbm_to_vmem [thread:$0]  %s195_s1, 512, %s16_s10, [#allocation4], %s151_s12, %s151_s12, %s152_s13  }
   0xc   :  { %148 = dma.done.wait [#allocation4], 512  }
   0xd   :  { %149 = vsyncadd [#allocation4], 4294966784  ;;  %vm30_vm0 = vcmask 261120   ;;  %v153_v0 = vmov 0.0   ;;  %vm154_vm1 = vmmov 0   ;;  %v40_v1 = vld [vmem:[#allocation3 + $0x10] sm:$0xff] }
   0xe   :  { %31 = vst.msk [vmem:[#allocation2] sm:$0xff] %vm30_vm0, %v153_v0  ;;  %32 = vst.msk [vmem:[#allocation2 + $0x8] sm:$0xff] %vm30_vm0, %v153_v0  ;;  %115 = vmatprep.subr.bf16.mxu0 %v153_v0  ;;  %119 = vmatprep.mubr.msk.bf16.mxu0 %vm154_vm1, %v153_v0  ;;  %v41_v2 = vld [vmem:[#allocation3 + $0x18] sm:$0xff]  ;;  %v38_v4 = vld [vmem:[#allocation3] sm:$0xff] }
   0xf   :  { %v43_v3 = vpack.c.bf16 %v41_v2, %v40_v1  ;;  %v39_v5 = vld [vmem:[#allocation3 + $0x8] sm:$0xff]  ;;  %v35_v9 = vld [vmem:[%s194_s0] sm:$0xff]  ;;  %v36_v10 = vld [vmem:[%s194_s0 + $0x8] sm:$0xff] }
  0x10   :  { %v42_v7 = vpack.c.bf16 %v39_v5, %v38_v4  ;;  %v37_v11 = vpack.c.bf16 %v36_v10, %v35_v9 }
  0x11   :  { %v52_v6 = vsel %vm30_vm0, %v43_v3, 0 }
  0x12   :  { %116 = vmatpush3.bf16.xpose.msra.mxu0 %v52_v6  ;;  %v49_v8 = vsel %vm30_vm0, %v42_v7, 0 }
  0x13   :  { %117 = vmatprep.subr.bf16.mxu0 %v153_v0 }
  0x15   :  { %v33_v12 = vld [vmem:[#allocation2] sm:$0xff]  ;;  %v34_v16 = vld [vmem:[#allocation2 + $0x8] sm:$0xff] }
  0x1a   :  { %118 = vmatpush3.bf16.xpose.msra.mxu0 %v49_v8 }
  0x21   :  { %120 = vmatmul.mubr.msk.bf16.vlgmr.msra.gmra.mxu0 %vm30_vm0, %v37_v11 }
  0xe1   :  { %v88_v13 = vpop.f32.mrf.mxu0 }
  0xe2   :  { %v95_v14 = vadd.f32 %v88_v13, %v33_v12 }
  0xe3   :  { %v121_v15 = vpop.f32.mrf.mxu0 }
  0xe4   :  { %97 = vst.msk [vmem:[#allocation2] sm:$0xff] %vm30_vm0, %v95_v14 }
  0xe5   :  { %v91_v17 = vpop.f32.mrf.mxu0 }
  0xe6   :  { %v96_v18 = vadd.f32 %v91_v17, %v34_v16 }
  0xe7   :  { %v122_v19 = vpop.f32.mrf.mxu0 }
  0xe8   :  { %98 = vst.msk [vmem:[#allocation2 + $0x8] sm:$0xff] %vm30_vm0, %v96_v18 }
  0xeb   :  { %v102_v20 = vld [vmem:[#allocation2] sm:$0xff] }
  0xec   :  { %104 = vst.msk [vmem:[%s196_s2] sm:$0xff] %vm30_vm0, %v102_v20 }
  0xef   :  { %v103_v21 = vld [vmem:[#allocation2 + $0x8] sm:$0xff] }
  0xf0   :  { %105 = vst.msk [vmem:[%s196_s2 + $0x8] sm:$0xff] %vm30_vm0, %v103_v21 }
  0xf1   :  { %110 = vsyncpa [#allocation4], 1 }

// kernel: casual_multihead_diff_attn.8
= control target key start
LH: loop header
LB: loop body
LE: loop exit
PB: predicated region body
PF: predicated region fallthrough
CT: control target
= control target key end

     0   :  { %s1138_s0 = inlined_call_operand.<no memory space> [shape: f32[1,1], index: 0, kind: input, shape index: {}]   ;;  %s1139_s1 = inlined_call_operand.vmem [shape: f32[2,8,8,4], index: 1, kind: input, shape index: {}]   ;;  %s1140_s2 = inlined_call_operand.vmem [shape: f32[2,8,8,4], index: 2, kind: input, shape index: {}]   ;;  %s1141_s3 = inlined_call_operand.vmem [shape: f32[2,4,8,8], index: 3, kind: input, shape index: {}]   ;;  %s1142_s4 = inlined_call_operand.hbm [shape: f32[2,4,8,8], index: 4, kind: output, shape index: {0}]   ;;  %s1143_s5 = inlined_call_operand.vmem [shape: f32[2,4,8,8], index: 5, kind: output, shape index: {1}]  }
   0x1   :  { %1145 = sst [smem:[#allocation6_spill]] %s1139_s1 }
   0x2   :  { %1146 = sst [smem:[#allocation7_spill]] %s1140_s2 }
   0x3   :  { %11 = sst [smem:[#allocation2]] %s1138_s0 }
   0x4   :  { %12 = vsyncpa [#allocation4], 0 }
   0x5   :  { %14 = vsyncpa [#allocation4 + $0x1], 0  ;;  %s982_s20 = smov 0   ;;  %s984_s21 = smov 0  }
   0x6   :  { %s986_s22 = smov 0   ;;  %s988_s23 = smov 0  }
   0x7   :  { %s990_s24 = smov 0   ;;  %s992_s25 = smov 0  }
   0x8   :  { %s994_s26 = smov 0   ;;  %s996_s27 = smov 0  }
   0x9 LB: > { %s721_s0 = sadd.s32 4294967295, %s944_s27   ;;  %s722_s28 = sadd.s32 4294967294, %s944_s27   ;;  %s944_s27 = sphi %s996_s27, %s20_s27   ;;  %s940_s26 = sphi %s994_s26, %s1158_s26   ;;  %s936_s25 = sphi %s992_s25, %s1157_s25   ;;  %s932_s24 = sphi %s990_s24, %s1156_s24   ;;  %s928_s23 = sphi %s988_s23, %s1155_s23   ;;  %s924_s22 = sphi %s986_s22, %s1154_s22   ;;  %s920_s21 = sphi %s984_s21, %s1153_s21   ;;  %s916_s20 = sphi %s982_s20, %s1152_s20  }
   0xa   : > { %s29_s29 = sadd.s32 1, %s936_s25  ;;  %s32_s30 = sadd.s32 1, %s940_s26 }
   0xb   : > { %p30_p0 = scmp.ge.s32.totalorder %s29_s29, 4  ;;  %p156_p1 = scmp.ne.s32.totalorder %s924_s22, %s920_s21 }
   0xc   : > { %p157_p2 = scmp.eq.s32.totalorder %s721_s0, 7  ;;  %p162_p5 = scmp.ne.s32.totalorder %s920_s21, %s916_s20 }
   0xd   : > { %s1160_s29 = smov (%p30_p0, %s29_s29), 0  ;;  %s1162_s30 = smov (!%p30_p0, %s32_s30), %s940_s26 }
   0xe   : > { %s142_s6 = ssub.s32 %s936_s25, %s1160_s29  ;;  %p1033_p3 = por %p157_p2, %p156_p1 }
   0xf   : > { %p34_p4 = scmp.ge.s32.totalorder %s1162_s30, 2  ;;  %p163_p6 = scmp.eq.s32.totalorder %s722_s28, 7 }
  0x10   : > { %p725_p7 = scmp.ge.s32.totalorder %s944_s27, 1  ;;  %p249_p9 = scmp.lt.s32.totalorder %s944_s27, 9 }
  0x11   : > { %s1164_s30 = smov (%p34_p4, %s1162_s30), 0  ;;  %p1042_p8 = por %p163_p6, %p162_p5 }
  0x12   : > { %s141_s9 = ssub.s32 %s940_s26, %s1164_s30  ;;  %s146_s10 = sadd.s32 1, %s924_s22 }
  0x13   : > { %s143_s11 = sor.u32 %s142_s6, %s141_s9  ;;  %p250_p10 = pnand %p725_p7, %p249_p9 }
  0x14   : > { %p144_p11 = scmp.eq.s32.totalorder %s143_s11, 0  ;;  %s727_s13 = sshll.u32 (!%p250_p10), %s928_s23, 1 }
  0x15   : > { %253 = sbr.rel (%p250_p10) target bundleno = 915 (0x393), region = 36  ;;  %p307_p12 = scmp.lt.s32.totalorder (!%p250_p10), %s932_s24, 1 }
  0x16   : > { %s1051_s12 = scalar_select %p144_p11, %s924_s22, %s146_s10  }
  0x17   : > { %p309_p13 = scmp.lt.s32.totalorder (!%p250_p10), %s727_s13, 7  ;;  %s1149_s1 = sld [smem:[#allocation6_spill]] (!%p250_p10) }
  0x18   : > { %s1150_s2 = sld [smem:[#allocation7_spill]] (!%p250_p10)  ;;  %p328_p0 = scmp.lt.s32.totalorder (!%p250_p10), %s928_s23, 3 }
  0x19   : > { %s293_s19 = sand.u32 (!%p250_p10), 1, %s920_s21   ;;  %s741_s6 = sshll.u32 (!%p250_p10), %s932_s24, 2 }
  0x1a   : > { %v946_v0 = vmov 0.0   ;;  %s1056_s14 = scalar_select %p307_p12, %s932_s24, 1  ;;  %vm947_vm0 = vmmov 0   ;;  %vm354_vm1 = vcmask 31744   ;;  %v447_v13 = vlaneseq }
  0x1b   : > { %751 = vmatprep.subr.bf16.mxu0 %v946_v0  ;;  %757 = vmatprep.subr.bf16.mxu1 %v946_v0  ;;  %s1166_s13 = smov (!%p309_p13, %s727_s13), 7  ;;  %vm456_vm3 = vcmask 64512   ;;  %vm489_vm4 = vcmask 1043456  }
  0x1c   : > { %753 = vmatprep.mubr.msk.bf16.mxu0 %vm947_vm0, %v946_v0  ;;  %759 = vmatprep.mubr.msk.bf16.mxu1 %vm947_vm0, %v946_v0  ;;  %s728_s15 = sshll.u32 %s1056_s14, 3  ;;  %v448_v14 = vshrl.u32 %v447_v13, 7  ;;  %v450_v15 = vand.u32 127, %v447_v13  ;;  %s733_s11 = sshll.u32 %s1056_s14, 2 }
  0x1d   : > { %s312_s16 = sadd.s32 %s728_s15, %s1166_s13  ;;  %s479_s14 = sld [smem:[#allocation2]] }
  0x1e   : > { %s729_s17 = sshll.u32 %s312_s16, 3  ;;  %vm451_vm2 = vcmp.ge.s32.totalorder %v448_v14, %v450_v15 }
  0x1f   : > { %s314_s0 = scalar_lea.vmem %s1149_s1, %s729_s17  ;;  %s324_s9 = scalar_lea.vmem %s1150_s2, %s729_s17 }
  0x20   : > { %v343_v1 = vld [vmem:[%s314_s0] sm:$0xff]  ;;  %v344_v3 = vld [vmem:[%s314_s0 + $0x8] sm:$0xff]  ;;  %s329_s10 = scalar_select %p328_p0, %s928_s23, 3 }
  0x21   : > { %v347_v2 = vld [vmem:[%s324_s9] sm:$0xff]  ;;  %v348_v5 = vld [vmem:[%s324_s9 + $0x8] sm:$0xff]  ;;  %v345_v7 = vmul.f32 0.5, %v343_v1  ;;  %v346_v9 = vmul.f32 0.5, %v344_v3  ;;  %s726_s0 = sshll.u32 %s293_s19, 3  ;;  %s564_s9 = sadd.s32 %s928_s23, %s741_s6 }
  0x22   : > { %v352_v4 = vpack.c.bf16 %v347_v2, %v347_v2  ;;  %v353_v6 = vpack.c.bf16 %v348_v5, %v348_v5  ;;  %s1075_s13 = sadd.s32 %s733_s11, %s329_s10  ;;  %s295_s28 = scalar_lea.vmem [#allocation3], %s726_s0 }
  0x23   : > { %v350_v11 = vpack.c.bf16 %v345_v7, %v345_v7  ;;  %v351_v12 = vpack.c.bf16 %v346_v9, %v346_v9  ;;  %s1144_s15 = sshll.u32 %s1075_s13, 3  ;;  %v480_v45 = vstv %s479_s14  ;;  %s742_s10 = sshll.u32 %s564_s9, 7 }
  0x24   : > { %v359_v8 = vsel %vm354_vm1, %v352_v4, 0  ;;  %v405_v10 = vsel %vm354_vm1, %v353_v6, 0  ;;  %s333_s18 = scalar_lea.vmem %s1141_s3, %s1144_s15  ;;  %s568_s11 = sshll.u32 %s295_s28, 4  ;;  %s569_s11 = int_to_ptr.vmem [resolvable:$true] %s568_s11 }
  0x25   : > { %752 = vmatpush3.bf16.xpose.msra.mxu0 %v359_v8  ;;  %758 = vmatpush3.bf16.xpose.msra.mxu1 %v405_v10  ;;  %v349_v38 = vld [vmem:[%s333_s18] sm:$0xff]  ;;  %s566_s18 = scalar_lea.hbm %s1142_s4, %s742_s10  ;;  %s545_s14 = scalar_lea.sflag [#allocation4], %s293_s19 }
  0x26   : > { %763 = vmatprep.subr.bf16.mxu0 %v946_v0  ;;  %v485_v39 = vpack.c.bf16 %v349_v38, %v349_v38  ;;  %s852_s0 = scalar_lea.vmem %s569_s11, 128  ;;  %s948_s15 = smov [#allocation3]  }
  0x27   : > { %p853_p1 = scmp.ne.s32.totalorder %s569_s11, %s852_s0  ;;  %s856_s1 = sshll.u32 %s948_s15, 4  ;;  %s857_s1 = int_to_ptr.vmem [resolvable:$false] %s856_s1 }
  0x28   : > { %v491_v40 = vsel %vm489_vm4, %v485_v39, 0  ;;  %s858_s2 = scalar_lea.vmem %s857_s1, 256  ;;  %p859_p5 = scmp.lt.s32.totalorder %s569_s11, %s857_s1 }
  0x29   : > { %p854_p2 = pnand %p853_p1, %p1033_p3  ;;  %p860_p6 = scmp.lt.s32.totalorder %s858_s2, %s852_s0 }
  0x2b   : > { %p855_p4 = pneg %p854_p2  ;;  %p861_p7 = por %p860_p6, %p859_p5 }
  0x2c   : > { %754 = vmatmul.mubr.msk.bf16.vlgmr.msra.gmra.mxu0 %vm354_vm1, %v350_v11  ;;  %760 = vmatmul.mubr.msk.bf16.vlgmr.msra.gmra.mxu1 %vm354_vm1, %v351_v12 }
  0x2d   : > { %765 = vmatprep.mubr.msk.bf16.mxu0 %vm947_vm0, %v946_v0  ;;  %764 = vmatpush3.bf16.msra.mxu0 %v491_v40  ;;  %p862_p9 = pnand %p861_p7, %p855_p4 }
  0xec   : > { %v395_v16 = vpop.f32.mrf.mxu0  ;;  %v441_v17 = vpop.f32.mrf.mxu1 }
  0xed   : > { %v454_v18 = vsel %vm451_vm2, %v395_v16, -3.4028235e+38  ;;  %v455_v19 = vsel %vm451_vm2, %v441_v17, -3.4028235e+38 }
  0xee   : > { %v755_v20 = vpop.f32.mrf.mxu0  ;;  %v761_v21 = vpop.f32.mrf.mxu1  ;;  %v460_v22 = vsel %vm456_vm3, %v455_v19, -inf  ;;  %v457_v25 = vsel %vm456_vm3, %v454_v18, -inf }
  0xef   : > { %461 = vmax.xlane.f32.xlu0 %v460_v22 }
  0xf0   : > { %v398_v23 = vpop.f32.mrf.mxu0  ;;  %v444_v24 = vpop.f32.mrf.mxu1 }
  0xf2   : > { %v756_v26 = vpop.f32.mrf.mxu0  ;;  %v762_v27 = vpop.f32.mrf.mxu1 }
  0xf3   : > { %458 = vmax.xlane.f32.xlu0 %v457_v25 }
 0x178   : > { %v462_v28 = vpop.xlane.xlu0 %461 }
 0x179   : > { %v464_v29 = vsub.f32 %v455_v19, %v462_v28 }
 0x17b   : > { %v467_v30 = vmul.f32 1.442695, %v464_v29 }
 0x17c   : > { %v459_v31 = vpop.xlane.xlu0 %458 }
 0x17d   : > { %842 = vpow2.f32 %v467_v30  ;;  %v463_v32 = vsub.f32 %v454_v18, %v459_v31 }
 0x17f   : > { %v465_v33 = vmul.f32 1.442695, %v463_v32 }
 0x181   : > { %844 = vpow2.f32 %v465_v33 }
 0x18a   : > { %v843_v34 = vpop.eup %842 }
 0x18b   : > { %v472_v35 = vsel %vm456_vm3, %v843_v34, 0.0 }
 0x18c   : > { %473 = vadd.xlane.f32.xlu1 %v472_v35 }
 0x18e   : > { %v845_v36 = vpop.eup %844 }
 0x18f   : > { %v469_v37 = vsel %vm456_vm3, %v845_v36, 0.0 }
 0x190   : > { %470 = vadd.xlane.f32.xlu1 %v469_v37 }
 0x215   : > { %v474_v41 = vpop.xlane.xlu1 %473 }
 0x216   : > { %846 = vrcp.f32 %v474_v41 }
 0x219   : > { %v471_v42 = vpop.xlane.xlu1 %470 }
 0x21a   : > { %848 = vrcp.f32 %v471_v42 }
 0x223   : > { %v847_v43 = vpop.eup %846 }
 0x224   : > { %v478_v44 = vmul.f32 %v847_v43, %v843_v34 }
 0x226   : > { %v481_v48 = vmul.f32 %v480_v45, %v478_v44 }
 0x227   : > { %v849_v46 = vpop.eup %848 }
 0x228   : > { %v477_v47 = vmul.f32 %v849_v46, %v845_v36 }
 0x22a   : > { %v482_v49 = vsub.f32 %v477_v47, %v481_v48 }
 0x22c   : > { %v484_v50 = vpack.c.bf16 %v482_v49, %v482_v49  ;;  %483 = vst.msk [vmem:[%s295_s28] sm:$0xff] %vm456_vm3, %v482_v49 }
 0x22e   : > { %766 = vmatmul.mubr.msk.bf16.vlgmr.msra.gmra.mxu0 %vm456_vm3, %v484_v50 }
 0x2ee   : > { %v527_v51 = vpop.f32.mrf.mxu0 }
 0x2ef   : > { %v533_v52 = vmul.f32 %v527_v51, %v527_v51 }
 0x2f0   : > { %v767_v53 = vpop.f32.mrf.mxu0 }
 0x2f1   : > { %v534_v54 = vsel %vm456_vm3, %v533_v52, 0.0 }
 0x2f2   : > { %535 = vadd.xlane.f32.xlu0 %v534_v54  ;;  %v530_v55 = vpop.f32.mrf.mxu0 }
 0x2f4   : > { %v768_v56 = vpop.f32.mrf.mxu0 }
 0x2f5   : > { %865 = shalt.err (!%p862_p9)
}
 0x2f6   : > { %s866_s23 = scalar_lea.hbm %s566_s18, 128  ;;  %s870_s28 = scalar_lea.hbm %s1142_s4, 1024 }
 0x2f7   : > { %p867_p10 = scmp.ne.s32.totalorder %s566_s18, %s866_s23  ;;  %p871_p13 = scmp.lt.s32.totalorder %s566_s18, %s1142_s4 }
 0x2f8   : > { %p872_p0 = scmp.lt.s32.totalorder %s870_s28, %s866_s23 }
 0x2f9   : > { %p868_p11 = pnand %p867_p10, %p1033_p3 }
 0x2fa   : > { %p873_p1 = por %p872_p0, %p871_p13 }
 0x2fb   : > { %p869_p12 = pneg %p868_p11 }
 0x2fd   : > { %p874_p2 = pnand %p873_p1, %p869_p12 }
 0x2ff   : > { %877 = shalt.err (!%p874_p2)
}
 0x300   : > { %769 = dma.vmem_to_hbm [thread:$0]  (%p1033_p3), %s569_s11, 128, %s566_s18, %s545_s14  }
 0x301   : > { %s1151_s1 = sshll.u32 %s1075_s13, 3 }
 0x302   : > { %s341_s10 = scalar_lea.vmem %s1143_s5, %s1151_s1 }
 0x37b   : > { %v536_v57 = vpop.xlane.xlu0 %535 }
 0x37c   : > { %v538_v58 = vmul.f32 0.125, %v536_v57 }
 0x37e   : > { %v539_v59 = vadd.f32 1e-05, %v538_v58 }
 0x380   : > { %850 = vrsqrt.f32 %v539_v59 }
 0x38d   : > { %v851_v60 = vpop.eup %850 }
 0x38e   : > { %v541_v61 = vmul.f32 %v851_v60, %v527_v51 }
 0x390   : > { %v542_v62 = vmul.f32 0.8, %v541_v61 }
 0x392   : > { %543 = vst.msk [vmem:[%s341_s10] sm:$0xff] %vm456_vm3, %v542_v62 }
 0x393 PF: > { %p775_p4 = scmp.ge.s32.totalorder %s944_s27, 2  ;;  %s583_s7 = sand.u32 1, %s916_s20  }
 0x394   : > { %s584_s11 = scalar_lea.sflag [#allocation4], %s583_s7 }
 0x395   : > { %p772_p3 = pnand %p775_p4, %p1042_p8 }
 0x397   : > { %p773_p5 = pneg %p772_p3 }
 0x399   : > { %911 = dma.done.wait (%p773_p5), %s584_s11, 128  }
 0x39a   : > { %913 = vsyncadd (%p773_p5), %s584_s11, 4294967168  ;;  %s20_s27 = sadd.s32 1, %s944_s27   ;;  %s1152_s20 = smov %s920_s21 }
 0x39b   : > { %p17_p6 = scmp.ge.s32.totalorder %s20_s27, 10   ;;  %s1153_s21 = smov %s924_s22 }
 0x39c   : > { %s1154_s22 = smov %s1051_s12  ;;  %s1155_s23 = smov %s936_s25 }
 0x39d   : > { %s1156_s24 = smov %s940_s26  ;;  %s1157_s25 = smov %s1160_s29 }
 0x39e   : > { %s1158_s26 = smov %s1164_s30  ;;  %19 = sbr.rel (!%p17_p6) target bundleno = 9 (0x9), region = 89 }
 0x3a3   :  { %600 = vsyncpa [#allocation4], 1 }
 0x3a4   :  { %602 = vsyncpa [#allocation4 + $0x1], 1 }

// kernel: casual_multihead_diff_attn.9
= control target key start
LH: loop header
LB: loop body
LE: loop exit
PB: predicated region body
PF: predicated region fallthrough
CT: control target
= control target key end

     0   :  { %vm17_vm0 = vcmask 261120   ;;  %v148_v2 = vmov 0.0   ;;  %vm149_vm1 = vmmov 0   ;;  %s198_s0 = inlined_call_operand.vmem [shape: f32[16,32], index: 0, kind: input, shape index: {}]   ;;  %s199_s1 = inlined_call_operand.vmem [shape: f32[32,32], index: 1, kind: input, shape index: {}]   ;;  %s200_s2 = inlined_call_operand.hbm [shape: f32[16,32], index: 2, kind: output, shape index: {}]  }
   0x1   :  { %v27_v0 = vld [vmem:[%s199_s1 + $0x10] sm:$0xff]  ;;  %v28_v1 = vld [vmem:[%s199_s1 + $0x18] sm:$0xff]  ;;  %113 = vmatprep.subr.bf16.mxu0 %v148_v2  ;;  %18 = vst.msk [vmem:[#allocation2] sm:$0xff] %vm17_vm0, %v148_v2  ;;  %19 = vst.msk [vmem:[#allocation2 + $0x8] sm:$0xff] %vm17_vm0, %v148_v2  ;;  %117 = vmatprep.mubr.msk.bf16.mxu0 %vm149_vm1, %v148_v2 }
   0x2   :  { %v30_v3 = vpack.c.bf16 %v28_v1, %v27_v0  ;;  %v25_v4 = vld [vmem:[%s199_s1] sm:$0xff]  ;;  %v26_v5 = vld [vmem:[%s199_s1 + $0x8] sm:$0xff] }
   0x3   :  { %7 = vsyncpa [#allocation4], 0  ;;  %v29_v7 = vpack.c.bf16 %v26_v5, %v25_v4  ;;  %v22_v9 = vld [vmem:[%s198_s0] sm:$0xff]  ;;  %v23_v10 = vld [vmem:[%s198_s0 + $0x8] sm:$0xff]  ;;  %s150_s1 = smov [#allocation3]  }
   0x4   :  { %v39_v6 = vsel %vm17_vm0, %v30_v3, 0  ;;  %v24_v11 = vpack.c.bf16 %v23_v10, %v22_v9  ;;  %s98_s21 = sshll.u32 %s150_s1, 4  ;;  %s99_s21 = int_to_ptr.vmem [resolvable:$true] %s98_s21 }
   0x5   :  { %114 = vmatpush3.bf16.xpose.msra.mxu0 %v39_v6  ;;  %v36_v8 = vsel %vm17_vm0, %v29_v7, 0  ;;  %s126_s0 = scalar_lea.vmem %s99_s21, 256  ;;  %p131_p1 = scmp.lt.s32.totalorder %s99_s21, %s99_s21 }
   0x6   :  { %115 = vmatprep.subr.bf16.mxu0 %v148_v2  ;;  %p127_p0 = scmp.ne.s32.totalorder %s99_s21, %s126_s0  ;;  %p132_p2 = scmp.lt.s32.totalorder %s126_s0, %s126_s0 }
   0x8   :  { %v20_v12 = vld [vmem:[#allocation2] sm:$0xff]  ;;  %v21_v16 = vld [vmem:[#allocation2 + $0x8] sm:$0xff]  ;;  %p133_p3 = por %p132_p2, %p131_p1 }
   0xa   :  { %p134_p4 = pnand %p133_p3, %p127_p0 }
   0xd   :  { %116 = vmatpush3.bf16.xpose.msra.mxu0 %v36_v8 }
  0x14   :  { %118 = vmatmul.mubr.msk.bf16.vlgmr.msra.gmra.mxu0 %vm17_vm0, %v24_v11 }
  0xd4   :  { %v75_v13 = vpop.f32.mrf.mxu0 }
  0xd5   :  { %v82_v14 = vadd.f32 %v75_v13, %v20_v12 }
  0xd6   :  { %v119_v15 = vpop.f32.mrf.mxu0 }
  0xd7   :  { %84 = vst.msk [vmem:[#allocation2] sm:$0xff] %vm17_vm0, %v82_v14 }
  0xd8   :  { %v78_v17 = vpop.f32.mrf.mxu0 }
  0xd9   :  { %v83_v18 = vadd.f32 %v78_v17, %v21_v16 }
  0xda   :  { %v120_v19 = vpop.f32.mrf.mxu0 }
  0xdb   :  { %85 = vst.msk [vmem:[#allocation2 + $0x8] sm:$0xff] %vm17_vm0, %v83_v18 }
  0xde   :  { %v89_v20 = vld [vmem:[#allocation2] sm:$0xff] }
  0xdf   :  { %91 = vst.msk [vmem:[#allocation3] sm:$0xff] %vm17_vm0, %v89_v20 }
  0xe2   :  { %v90_v21 = vld [vmem:[#allocation2 + $0x8] sm:$0xff] }
  0xe3   :  { %92 = vst.msk [vmem:[#allocation3 + $0x8] sm:$0xff] %vm17_vm0, %v90_v21 }
  0xe4   :  { %137 = shalt.err (!%p134_p4)
}
  0xe5   :  { %s151_s22 = smov 128   ;;  %s152_s23 = smov 8  }
  0xe6   :  { %104 = dma.vmem_to_hbm [thread:$0]  %s99_s21, 256, %s200_s2, [#allocation4], %s151_s22, %s151_s22, %s152_s23  }
  0xe7   :  { %146 = dma.done.wait [#allocation4], 256  }
  0xe8   :  { %147 = vsyncadd [#allocation4], 4294967040 }
  0xe9   :  { %108 = vsyncpa [#allocation4], 1 }

</bundles_post_ra>
